<compile_context>
chip_gen: v7x
topology: tpu7x:2x2x1
jax: 0.10.0
libtpu: 0.0.40
codegen_flags: <defaults>
</compile_context>

<pallas_src>
import math

import jax
import jax.numpy as jnp
from jax.experimental import pallas as pl
from jax.experimental.pallas import tpu as pltpu

DIM_STATE = 8     # LunarLanderContinuous-v2 observation dim
DIM_ACTION = 2    # LunarLanderContinuous-v2 action dim
H1 = 400
H2 = 200

# Lane-aligned padded sizes.
H1P = 512                 # 400 -> 512
H2P = 256                 # 200 -> 256 (per head)
H2F = 2 * H2P             # fused mu||sigma hidden width = 512
OUT_PAD = 128             # fused, lane-dense output width
HALF = OUT_PAD // 2       # mu lives in cols [0, HALF), sigma in [HALF, OUT_PAD)


def actor_kernel(s_ref, w1_ref, b1_ref, w2_ref, b2_ref, w3_ref, b3_ref, out_ref):
    # Layer 1 (shared trunk): x = relu(state @ W1 + b1)          (bt, H1P)
    x = jnp.dot(s_ref[...].astype(jnp.bfloat16), w1_ref[...],
                preferred_element_type=jnp.float32)
    x = jnp.maximum(x + b1_ref[...], 0.0)

    # Layer 2 (fused mu/sigma hidden): h = relu(x @ [Wmu1|Wsg1] + b)   (bt, H2F)
    h = jnp.dot(x.astype(jnp.bfloat16), w2_ref[...],
                preferred_element_type=jnp.float32)
    h = jnp.maximum(h + b2_ref[...], 0.0)

    # Layer 3 (block-diagonal fused output): z = h @ W3 + b3     (bt, OUT_PAD)
    z = jnp.dot(h.astype(jnp.bfloat16), w3_ref[...],
                preferred_element_type=jnp.float32)
    z = z + b3_ref[...]

    # tanh on the mu half of the lanes, sigmoid on the sigma half.
    col = jax.lax.broadcasted_iota(jnp.int32, z.shape, dimension=1)
    out = jnp.where(col < HALF, jnp.tanh(z), jax.nn.sigmoid(z))
    out_ref[...] = out.astype(out_ref.dtype)


def prepare_params(params):
    """Pad / fuse / cast the per-layer PyTorch-style params once (kept in HBM,
    DMA'd to VMEM once per pallas_call and resident across the batch grid)."""
    (w1, b1, wmu1, bmu1, wmu2, bmu2, wsg1, bsg1, wsg2, bsg2) = params
    bf = jnp.bfloat16

    w1p = jnp.zeros((DIM_STATE, H1P), bf).at[:, :H1].set(w1.astype(bf))
    b1p = jnp.zeros((1, H1P), jnp.float32).at[:, :H1].set(b1)

    w2p = jnp.zeros((H1P, H2F), bf)
    w2p = w2p.at[:H1, :H2].set(wmu1.astype(bf))
    w2p = w2p.at[:H1, H2P:H2P + H2].set(wsg1.astype(bf))
    b2p = jnp.zeros((1, H2F), jnp.float32)
    b2p = b2p.at[:, :H2].set(bmu1)
    b2p = b2p.at[:, H2P:H2P + H2].set(bsg1)

    w3p = jnp.zeros((H2F, OUT_PAD), bf)
    w3p = w3p.at[:H2, :DIM_ACTION].set(wmu2.astype(bf))
    w3p = w3p.at[H2P:H2P + H2, HALF:HALF + DIM_ACTION].set(wsg2.astype(bf))
    b3p = jnp.zeros((1, OUT_PAD), jnp.float32)
    b3p = b3p.at[:, :DIM_ACTION].set(bmu2)
    b3p = b3p.at[:, HALF:HALF + DIM_ACTION].set(bsg2)

    return (w1p, b1p, w2p, b2p, w3p, b3p)


def actor_forward(state, prepared, b_tile=256):
    """state: (B, DIM_STATE) f32 -> (mu, sigma), each (B, DIM_ACTION) f32."""
    w1p, b1p, w2p, b2p, w3p, b3p = prepared
    B = state.shape[0]

    # Pick the batch tile; pad B up to a multiple of it (8-row granularity).
    bt = b_tile if B >= b_tile else max(8, ((B + 7) // 8) * 8)
    B_pad = ((B + bt - 1) // bt) * bt
    if B_pad != B:
        state = jnp.pad(state, ((0, B_pad - B), (0, 0)))

    def const_spec(shape):
        return pl.BlockSpec(shape, lambda i: (0, 0))

    out = pl.pallas_call(
        actor_kernel,
        out_shape=jax.ShapeDtypeStruct((B_pad, OUT_PAD), jnp.float32),
        grid=(B_pad // bt,),
        in_specs=[
            pl.BlockSpec((bt, DIM_STATE), lambda i: (i, 0)),   # state tile
            const_spec((DIM_STATE, H1P)), const_spec((1, H1P)),
            const_spec((H1P, H2F)),       const_spec((1, H2F)),
            const_spec((H2F, OUT_PAD)),   const_spec((1, OUT_PAD)),
        ],
        out_specs=pl.BlockSpec((bt, OUT_PAD), lambda i: (i, 0)),
        compiler_params=pltpu.CompilerParams(
            dimension_semantics=("parallel",)),
    )(state, w1p, b1p, w2p, b2p, w3p, b3p)

    mu = out[:B, 0:DIM_ACTION]
    sigma = out[:B, HALF:HALF + DIM_ACTION]
    return mu, sigma


def init_params(key):
    """Deterministic init mimicking PyTorch's default Linear init
    (uniform in +/- 1/sqrt(fan_in)).  Weights are (in, out)."""
    def linear(key, fan_in, fan_out):
        kw, kb = jax.random.split(key)
        bound = 1.0 / math.sqrt(fan_in)
        w = jax.random.uniform(kw, (fan_in, fan_out), jnp.float32, -bound, bound)
        b = jax.random.uniform(kb, (1, fan_out), jnp.float32, -bound, bound)
        return w, b

    keys = jax.random.split(key, 5)
    w1, b1 = linear(keys[0], DIM_STATE, H1)
    wmu1, bmu1 = linear(keys[1], H1, H2)
    wmu2, bmu2 = linear(keys[2], H2, DIM_ACTION)
    wsg1, bsg1 = linear(keys[3], H1, H2)
    wsg2, bsg2 = linear(keys[4], H2, DIM_ACTION)
    return (w1, b1, wmu1, bmu1, wmu2, bmu2, wsg1, bsg1, wsg2, bsg2)


def actor_reference_f32(state, params):
    """Pure-JAX f32 reference of the PyTorch forward pass (original semantics)."""
    (w1, b1, wmu1, bmu1, wmu2, bmu2, wsg1, bsg1, wsg2, bsg2) = params
    x = jnp.maximum(state @ w1 + b1, 0.0)
    hmu = jnp.maximum(x @ wmu1 + bmu1, 0.0)
    mu = jnp.tanh(hmu @ wmu2 + bmu2)
    hsg = jnp.maximum(x @ wsg1 + bsg1, 0.0)
    sigma = jax.nn.sigmoid(hsg @ wsg2 + bsg2)
    return mu, sigma


def actor_reference_bf16(state, params):
    """Pure-JAX reference with the same mixed precision as the kernel
    (bf16 matmul operands, f32 accumulation / elementwise math)."""
    (w1, b1, wmu1, bmu1, wmu2, bmu2, wsg1, bsg1, wsg2, bsg2) = params

    def mm(a, w):
        return jnp.dot(a.astype(jnp.bfloat16), w.astype(jnp.bfloat16),
                       preferred_element_type=jnp.float32)

    x = jnp.maximum(mm(state, w1) + b1, 0.0)
    hmu = jnp.maximum(mm(x, wmu1) + bmu1, 0.0)
    mu = jnp.tanh(mm(hmu, wmu2) + bmu2)
    hsg = jnp.maximum(mm(x, wsg1) + bsg1, 0.0)
    sigma = jax.nn.sigmoid(mm(hsg, wsg2) + bsg2)
    return mu, sigma


if __name__ == "__main__":
    key = jax.random.PRNGKey(0)
    pkey, skey = jax.random.split(key)

    params = init_params(pkey)
    prepared = prepare_params(params)

    B = 64  # small batch; b_tile=16 exercises a 4-step batch grid
    state = jax.random.normal(skey, (B, DIM_STATE), dtype=jnp.float32)

    mu, sigma = actor_forward(state, prepared, b_tile=16)
    jax.block_until_ready((mu, sigma))

    assert mu.shape == (B, DIM_ACTION) and sigma.shape == (B, DIM_ACTION)

    # Match the kernel's mixed-precision math tightly...
    mu_bf, sigma_bf = actor_reference_bf16(state, params)
    assert jnp.allclose(mu, mu_bf, atol=1e-3, rtol=1e-3)
    assert jnp.allclose(sigma, sigma_bf, atol=1e-3, rtol=1e-3)

    # ...and the original full-f32 module semantics within bf16-weight tolerance.
    mu_f32, sigma_f32 = actor_reference_f32(state, params)
    assert jnp.allclose(mu, mu_f32, atol=2e-2)
    assert jnp.allclose(sigma, sigma_f32, atol=2e-2)

    print("KERNEL_OK")
</pallas_src>

<mosaic_0001>
module attributes {stable_mosaic.version = 11 : i64} {
  func.func @actor_kernel(%arg0: i32, %arg1: memref<16x8xf32, #tpu.memory_space<vmem>>, %arg2: memref<8x512xbf16, #tpu.memory_space<vmem>>, %arg3: memref<1x512xf32, #tpu.memory_space<vmem>>, %arg4: memref<512x512xbf16, #tpu.memory_space<vmem>>, %arg5: memref<1x512xf32, #tpu.memory_space<vmem>>, %arg6: memref<512x128xbf16, #tpu.memory_space<vmem>>, %arg7: memref<1x128xf32, #tpu.memory_space<vmem>>, %arg8: memref<16x128xf32, #tpu.memory_space<vmem>>) attributes {dimension_semantics = [#tpu.dimension_semantics<parallel>], iteration_bounds = array<i64: 4>, scalar_prefetch = 0 : i64, scratch_operands = 0 : i64, tpu.core_type = #tpu.core_type<tc>, window_params = [{transform_indices = @transform_0, window_bounds = array<i64: 16, 8>}, {pipeline_mode = #tpu.pipeline_mode<synchronous>, transform_indices = @transform_1, window_bounds = array<i64: 8, 512>}, {pipeline_mode = #tpu.pipeline_mode<synchronous>, transform_indices = @transform_2, window_bounds = array<i64: 1, 512>}, {pipeline_mode = #tpu.pipeline_mode<synchronous>, transform_indices = @transform_3, window_bounds = array<i64: 512, 512>}, {pipeline_mode = #tpu.pipeline_mode<synchronous>, transform_indices = @transform_4, window_bounds = array<i64: 1, 512>}, {pipeline_mode = #tpu.pipeline_mode<synchronous>, transform_indices = @transform_5, window_bounds = array<i64: 512, 128>}, {pipeline_mode = #tpu.pipeline_mode<synchronous>, transform_indices = @transform_6, window_bounds = array<i64: 1, 128>}, {transform_indices = @transform_7, window_bounds = array<i64: 16, 128>}]} {
    %c0 = arith.constant 0 : index
    %c0_0 = arith.constant 0 : index
    %0 = vector.load %arg1[%c0, %c0_0] : memref<16x8xf32, #tpu.memory_space<vmem>>, vector<16x8xf32>
    %1 = arith.truncf %0 : vector<16x8xf32> to vector<16x8xbf16>
    %c0_1 = arith.constant 0 : index
    %c0_2 = arith.constant 0 : index
    %2 = vector.load %arg2[%c0_1, %c0_2] : memref<8x512xbf16, #tpu.memory_space<vmem>>, vector<8x512xbf16>
    %cst = arith.constant dense<0.000000e+00> : vector<16x512xf32>
    %3 = tpu.matmul %1, %2, %cst {dimension_numbers = #tpu.dot_dimension_numbers<[1], [0], [0], [1], [0, 0, 1, 1], [], []>} : vector<16x8xbf16>, vector<8x512xbf16>, vector<16x512xf32> -> vector<16x512xf32>
    %c0_3 = arith.constant 0 : index
    %c0_4 = arith.constant 0 : index
    %4 = vector.load %arg3[%c0_3, %c0_4] : memref<1x512xf32, #tpu.memory_space<vmem>>, vector<1x512xf32>
    %5 = vector.broadcast %4 : vector<1x512xf32> to vector<16x512xf32>
    %6 = arith.addf %3, %5 : vector<16x512xf32>
    %cst_5 = arith.constant 0.000000e+00 : f32
    %7 = vector.broadcast %cst_5 : f32 to vector<16x512xf32>
    %8 = arith.maximumf %6, %7 : vector<16x512xf32>
    %9 = arith.truncf %8 : vector<16x512xf32> to vector<16x512xbf16>
    %c0_6 = arith.constant 0 : index
    %c0_7 = arith.constant 0 : index
    %10 = vector.load %arg4[%c0_6, %c0_7] : memref<512x512xbf16, #tpu.memory_space<vmem>>, vector<512x512xbf16>
    %cst_8 = arith.constant dense<0.000000e+00> : vector<16x512xf32>
    %11 = tpu.matmul %9, %10, %cst_8 {dimension_numbers = #tpu.dot_dimension_numbers<[1], [0], [0], [1], [0, 0, 1, 1], [], []>} : vector<16x512xbf16>, vector<512x512xbf16>, vector<16x512xf32> -> vector<16x512xf32>
    %c0_9 = arith.constant 0 : index
    %c0_10 = arith.constant 0 : index
    %12 = vector.load %arg5[%c0_9, %c0_10] : memref<1x512xf32, #tpu.memory_space<vmem>>, vector<1x512xf32>
    %13 = vector.broadcast %12 : vector<1x512xf32> to vector<16x512xf32>
    %14 = arith.addf %11, %13 : vector<16x512xf32>
    %cst_11 = arith.constant 0.000000e+00 : f32
    %15 = vector.broadcast %cst_11 : f32 to vector<16x512xf32>
    %16 = arith.maximumf %14, %15 : vector<16x512xf32>
    %17 = arith.truncf %16 : vector<16x512xf32> to vector<16x512xbf16>
    %c0_12 = arith.constant 0 : index
    %c0_13 = arith.constant 0 : index
    %18 = vector.load %arg6[%c0_12, %c0_13] : memref<512x128xbf16, #tpu.memory_space<vmem>>, vector<512x128xbf16>
    %cst_14 = arith.constant dense<0.000000e+00> : vector<16x128xf32>
    %19 = tpu.matmul %17, %18, %cst_14 {dimension_numbers = #tpu.dot_dimension_numbers<[1], [0], [0], [1], [0, 0, 1, 1], [], []>} : vector<16x512xbf16>, vector<512x128xbf16>, vector<16x128xf32> -> vector<16x128xf32>
    %c0_15 = arith.constant 0 : index
    %c0_16 = arith.constant 0 : index
    %20 = vector.load %arg7[%c0_15, %c0_16] : memref<1x128xf32, #tpu.memory_space<vmem>>, vector<1x128xf32>
    %21 = vector.broadcast %20 : vector<1x128xf32> to vector<16x128xf32>
    %22 = arith.addf %19, %21 : vector<16x128xf32>
    %23 = tpu.iota {dimensions = array<i32: 1>} : vector<16x128xi32>
    %c64_i32 = arith.constant 64 : i32
    %24 = vector.broadcast %c64_i32 : i32 to vector<16x128xi32>
    %25 = arith.cmpi slt, %23, %24 : vector<16x128xi32>
    %26 = math.tanh %22 : vector<16x128xf32>
    %27 = arith.negf %22 : vector<16x128xf32>
    %28 = math.exp %27 : vector<16x128xf32>
    %cst_17 = arith.constant 1.000000e+00 : f32
    %29 = vector.broadcast %cst_17 : f32 to vector<16x128xf32>
    %30 = arith.addf %29, %28 : vector<16x128xf32>
    %31 = arith.divf %29, %30 : vector<16x128xf32>
    %32 = arith.select %25, %26, %31 : vector<16x128xi1>, vector<16x128xf32>
    %c0_18 = arith.constant 0 : index
    %c0_19 = arith.constant 0 : index
    %33 = vector.load %arg8[%c0_18, %c0_19] : memref<16x128xf32, #tpu.memory_space<vmem>>, vector<16x128xf32>
    tpu.vector_store %arg8[%c0_18, %c0_19], %32 {strides = array<i32>} : memref<16x128xf32, #tpu.memory_space<vmem>>, vector<16x128xf32>,
    return
  }
  func.func @transform_0(%arg0: i32) -> (i32, i32) {
    %c0_i32 = arith.constant 0 : i32
    %c0_i32_0 = arith.constant 0 : i32
    return %arg0, %c0_i32 : i32, i32
  }
  func.func @transform_1(%arg0: i32) -> (i32, i32) {
    %c0_i32 = arith.constant 0 : i32
    %c0_i32_0 = arith.constant 0 : i32
    %c0_i32_1 = arith.constant 0 : i32
    return %c0_i32, %c0_i32_0 : i32, i32
  }
  func.func @transform_2(%arg0: i32) -> (i32, i32) {
    %c0_i32 = arith.constant 0 : i32
    %c0_i32_0 = arith.constant 0 : i32
    %c0_i32_1 = arith.constant 0 : i32
    return %c0_i32, %c0_i32_0 : i32, i32
  }
  func.func @transform_3(%arg0: i32) -> (i32, i32) {
    %c0_i32 = arith.constant 0 : i32
    %c0_i32_0 = arith.constant 0 : i32
    %c0_i32_1 = arith.constant 0 : i32
    return %c0_i32, %c0_i32_0 : i32, i32
  }
  func.func @transform_4(%arg0: i32) -> (i32, i32) {
    %c0_i32 = arith.constant 0 : i32
    %c0_i32_0 = arith.constant 0 : i32
    %c0_i32_1 = arith.constant 0 : i32
    return %c0_i32, %c0_i32_0 : i32, i32
  }
  func.func @transform_5(%arg0: i32) -> (i32, i32) {
    %c0_i32 = arith.constant 0 : i32
    %c0_i32_0 = arith.constant 0 : i32
    %c0_i32_1 = arith.constant 0 : i32
    return %c0_i32, %c0_i32_0 : i32, i32
  }
  func.func @transform_6(%arg0: i32) -> (i32, i32) {
    %c0_i32 = arith.constant 0 : i32
    %c0_i32_0 = arith.constant 0 : i32
    %c0_i32_1 = arith.constant 0 : i32
    return %c0_i32, %c0_i32_0 : i32, i32
  }
  func.func @transform_7(%arg0: i32) -> (i32, i32) {
    %c0_i32 = arith.constant 0 : i32
    %c0_i32_0 = arith.constant 0 : i32
    return %arg0, %c0_i32 : i32, i32
  }
}

</mosaic_0001>

<bundles_post_ra>
// kernel: tpu_custom_call.1
= control target key start
LH: loop header
LB: loop body
LE: loop exit
PB: predicated region body
PF: predicated region fallthrough
CT: control target
= control target key end

     0   :  { %12 = vsyncpa [#allocation3], 0  ;;  %s2855_s0 = inlined_call_operand.vmem [shape: f32[64,8], index: 0, kind: input, shape index: {}]   ;;  %s2856_s1 = inlined_call_operand.vmem [shape: bf16[8,512], index: 1, kind: input, shape index: {}]   ;;  %s2857_s2 = inlined_call_operand.vmem [shape: f32[1,512], index: 2, kind: input, shape index: {}]   ;;  %s2858_s3 = inlined_call_operand.hbm [shape: bf16[512,512], index: 3, kind: input, shape index: {}]   ;;  %s2859_s4 = inlined_call_operand.vmem [shape: f32[1,512], index: 4, kind: input, shape index: {}]   ;;  %s2860_s5 = inlined_call_operand.hbm [shape: bf16[512,128], index: 5, kind: input, shape index: {}]   ;;  %s2861_s6 = inlined_call_operand.vmem [shape: f32[1,128], index: 6, kind: input, shape index: {}]   ;;  %s2862_s7 = inlined_call_operand.hbm [shape: f32[64,128], index: 7, kind: output, shape index: {}]  }
   0x1   :  { %13 = vsyncpa [#allocation6], 0 }
   0x2   :  { %14 = vsyncpa [#allocation4], 0 }
   0x3   :  { %16 = vsyncpa [#allocation4 + $0x1], 0  ;;  %s2634_s24 = smov 0   ;;  %s2636_s25 = smov 0  }
   0x4   :  { %s2638_s26 = smov 0   ;;  %s2640_s27 = smov 0  }
   0x5 LB: > { %s2655_s28 = sadd.s32 4294967295, %s2582_s27   ;;  %s1901_s29 = sadd.s32 4294967294, %s2582_s27   ;;  %s2582_s27 = sphi %s2640_s27, %s2882_s27   ;;  %s2578_s26 = sphi %s2638_s26, %s2881_s26   ;;  %s2574_s25 = sphi %s2636_s25, %s2880_s25   ;;  %s2570_s24 = sphi %s2634_s24, %s2879_s24  }
   0x6   : > { %s2659_s30 = sadd.s32 1, %s2582_s27   ;;  %s181_s8 = sadd.s32 1, %s2578_s26 }
   0x7   : > { %s178_s9 = ssub.s32 %s2582_s27, %s2659_s30  ;;  %p191_p0 = scmp.ne.s32.totalorder %s2578_s26, %s2574_s25 }
   0x8   : > { %p179_p1 = scmp.eq.s32.totalorder %s178_s9, 0  ;;  %p192_p2 = scmp.eq.s32.totalorder %s2655_s28, 3 }
   0x9   : > { %p197_p3 = scmp.ne.s32.totalorder %s2574_s25, %s2570_s24  ;;  %p198_p4 = scmp.eq.s32.totalorder %s1901_s29, 3 }
   0xa   : > { %s2670_s10 = scalar_select %p179_p1, %s2578_s26, %s181_s8  }
   0xb   : > { %p2672_p5 = por %p192_p2, %p191_p0  ;;  %p2676_p6 = por %p198_p4, %p197_p3 }
   0xc   : > { %2866 = sst [smem:[#allocation11_spill]] %s2670_s10  ;;  %p1902_p7 = scmp.ge.s32.totalorder %s2582_s27, 1 }
   0xd   : > { %s2867_s11 = scalar_select %p2672_p5, 1, 0 }
   0xe   : > { %s2868_s12 = scalar_select %p2676_p6, 1, 0 }
   0xf   : > { %p205_p8 = scmp.lt.s32.totalorder %s2582_s27, 5  ;;  %p2863_p9 = scmp.eq.s32.totalorder %s2655_s28, 0 }
  0x10   : > { %s2584_s14 = smov [#allocation2]   ;;  %s2585_s17 = smov [#allocation5]  }
  0x11   : > { %p2683_p10 = pnand %p1902_p7, %p205_p8  ;;  %s223_s15 = sshll.u32 %s2584_s14, 4  ;;  %s224_s15 = int_to_ptr.vmem [resolvable:$true] %s223_s15 }
  0x12   : > { %s239_s18 = sshll.u32 %s2585_s17, 4  ;;  %s2456_s21 = scalar_lea.hbm %s2858_s3, 16384  ;;  %s2695_s18 = int_to_ptr.vmem [resolvable:$true] %s239_s18 }
  0x13   : > { %s2869_s13 = scalar_select %p2683_p10, 1, 0 }
  0x14   : > { %p2159_p11 = pneg %p2683_p10  ;;  %p2457_p13 = scmp.ne.s32.totalorder %s2858_s3, %s2456_s21 }
  0x15   : > { %p2463_p3 = scmp.lt.u32.totalorder %s2456_s21, %s2858_s3 }
  0x16   : > { %p2691_p12 = pnand %p2863_p9, %p2159_p11 }
  0x18   : > { %p2458_p0 = pneg %p2691_p12 }
  0x1a   : > { %p2459_p1 = pnand %p2458_p0, %p2457_p13 }
  0x1c   : > { %p2460_p2 = pneg %p2459_p1 }
  0x1e   : > { %p2465_p4 = pnand %p2463_p3, %p2460_p2 }
  0x20   : > { %2468 = shalt.err (!%p2465_p4)
}
  0x21   : > { %s2469_s9 = scalar_lea.vmem %s224_s15, 16384  ;;  %p2477_p9 = scmp.lt.s32.totalorder %s224_s15, %s224_s15 }
  0x22   : > { %p2470_p7 = scmp.ne.s32.totalorder %s224_s15, %s2469_s9  ;;  %p2478_p6 = scmp.lt.s32.totalorder %s2469_s9, %s2469_s9 }
  0x24   : > { %p2472_p8 = pnand %p2470_p7, %p2458_p0  ;;  %p2479_p5 = por %p2478_p6, %p2477_p9 }
  0x26   : > { %p2473_p11 = pneg %p2472_p8 }
  0x28   : > { %p2480_p10 = pnand %p2479_p5, %p2473_p11 }
  0x2a   : > { %2483 = shalt.err (!%p2480_p10)
}
  0x2b   : > { %s2586_s14 = smov 256   ;;  %s2587_s17 = smov 16  }
  0x2c   : > { %2162 = dma.hbm_to_vmem [thread:$0]  (!%p2691_p12), %s2858_s3, 16384, %s224_s15, [#allocation3], %s2586_s14, %s2586_s14, %s2587_s17  }
  0x2d   : > { %s2484_s23 = scalar_lea.hbm %s2860_s5, 4096 }
  0x2e   : > { %p2485_p13 = scmp.ne.s32.totalorder %s2860_s5, %s2484_s23  ;;  %p2491_p9 = scmp.lt.u32.totalorder %s2484_s23, %s2860_s5 }
  0x30   : > { %p2487_p5 = pnand %p2485_p13, %p2458_p0 }
  0x32   : > { %p2488_p6 = pneg %p2487_p5 }
  0x34   : > { %p2493_p10 = pnand %p2491_p9, %p2488_p6 }
  0x36   : > { %2496 = shalt.err (!%p2493_p10)
}
  0x37   : > { %s2497_s15 = scalar_lea.vmem %s2695_s18, 4096  ;;  %p2505_p4 = scmp.lt.s32.totalorder %s2695_s18, %s2695_s18 }
  0x38   : > { %p2498_p1 = scmp.ne.s32.totalorder %s2695_s18, %s2497_s15  ;;  %p2506_p7 = scmp.lt.s32.totalorder %s2497_s15, %s2497_s15 }
  0x3a   : > { %p2500_p2 = pnand %p2498_p1, %p2458_p0  ;;  %p2507_p8 = por %p2506_p7, %p2505_p4 }
  0x3c   : > { %p2501_p3 = pneg %p2500_p2 }
  0x3e   : > { %p2508_p11 = pnand %p2507_p8, %p2501_p3 }
  0x40   : > { %2511 = shalt.err (!%p2508_p11)
}
  0x41   : > { %s2588_s10 = smov 64   ;;  %s2589_s14 = smov 4  }
  0x42   : > { %2165 = dma.hbm_to_vmem [thread:$0]  (!%p2691_p12), %s2860_s5, 4096, %s2695_s18, [#allocation6], %s2588_s10, %s2588_s10, %s2589_s14  }
  0x43   : > { %p2871_p13 = scmp.ne.s32.totalorder %s2869_s13, 0 }
  0x44   : > { %p2872_p0 = scmp.eq.s32.totalorder (!%p2871_p13), %s2655_s28, 0 }
  0x45   : > { %267 = sbr.rel (%p2871_p13) target bundleno = 860 (0x35c), region = 48 }
  0x4c   : > { %2557 = dma.done.wait (%p2872_p0), [#allocation3], 16384   ;;  %p2873_p5 = pmov %p2872_p0 }
  0x4d   : > { %p2874_p6 = pmov %p2872_p0 }
  0x4e   : > { %2559 = vsyncadd (%p2873_p5), [#allocation3], 4294950912 }
  0x4f   : > { %2561 = dma.done.wait (%p2874_p6), [#allocation6], 4096   ;;  %p2875_p9 = pmov %p2872_p0 }
  0x50   : > { %s1910_s16 = sshll.u32 %s2655_s28, 1  ;;  %v2590_v0 = vmov 0   ;;  %v314_v1 = vld [vmem:[%s2856_s1] sm:$0xff]  ;;  %vm352_vm0 = vcmask 1043456   ;;  %v315_v6 = vld [vmem:[%s2856_s1 + $0x8] sm:$0xff]  ;;  %vm348_vm1 = vcmask 64512  }
  0x51   : > { %2563 = vsyncadd (%p2875_p9), [#allocation6], 4294963200  ;;  %397 = vmatprep.mubr.bf16.mxu0 %v2590_v0  ;;  %p304_p12 = scmp.lt.s32.totalorder %s1910_s16, 7  ;;  %440 = vmatprep.mubr.bf16.mxu1 %v2590_v0  ;;  %v1913_v4 = vcombine.high %v314_v1, %v314_v1  ;;  %v1912_v5 = vcombine.low %v314_v1, %v314_v1  ;;  %v1915_v7 = vcombine.high %v315_v6, %v315_v6  ;;  %v2222_v9 = vld [vmem:[#allocation2 + $0x4] ss:$16 sps:$4 sm:$0xff]   ;;  %s2088_s18 = sshll.u32 %s2655_s28, 8 }
  0x52   : > { %v1914_v8 = vcombine.low %v315_v6, %v315_v6  ;;  %v2220_v12 = vld [vmem:[#allocation2] ss:$16 sps:$4 sm:$0xff]   ;;  %v2225_v13 = vld [vmem:[#allocation2 + $0xc] ss:$16 sps:$4 sm:$0xff]   ;;  %v2223_v15 = vld [vmem:[#allocation2 + $0x8] ss:$16 sps:$4 sm:$0xff]   ;;  %s2810_s29 = scalar_lea.hbm %s2862_s7, %s2088_s18 }
  0x53   : > { %s2884_s16 = smov (!%p304_p12, %s1910_s16), 7  ;;  %1916 = vmatprep.subr.msk.bf16.mxu0 %vm352_vm0, %v1913_v4  ;;  %v354_v10 = vsel %vm352_vm0, %v1912_v5, 0  ;;  %1918 = vmatprep.subr.msk.bf16.mxu1 %vm352_vm0, %v1915_v7  ;;  %v2228_v16 = vld [vmem:[#allocation2 + $0x24] ss:$16 sps:$4 sm:$0xff]   ;;  %v2231_v17 = vld [vmem:[#allocation2 + $0x2c] ss:$16 sps:$4 sm:$0xff]  }
  0x54   : > { %s1911_s13 = sshll.u32 %s2884_s16, 3  ;;  %366 = vmatpush1.bf16.msra.mxu0 %v354_v10  ;;  %v360_v14 = vsel %vm352_vm0, %v1914_v8, 0  ;;  %v2226_v18 = vld [vmem:[#allocation2 + $0x20] ss:$16 sps:$4 sm:$0xff]   ;;  %v2229_v19 = vld [vmem:[#allocation2 + $0x28] ss:$16 sps:$4 sm:$0xff]  }
  0x55   : > { %s307_s21 = scalar_lea.vmem %s2855_s0, %s1911_s13  ;;  %409 = vmatpush1.bf16.msra.mxu1 %v360_v14  ;;  %1253 = vmatprep.subr.bf16.mxu0 %v2222_v9  ;;  %v2234_v20 = vld [vmem:[#allocation2 + $0x44] ss:$16 sps:$4 sm:$0xff]   ;;  %v2237_v21 = vld [vmem:[#allocation2 + $0x4c] ss:$16 sps:$4 sm:$0xff]   ;;  %v2232_v22 = vld [vmem:[#allocation2 + $0x40] ss:$16 sps:$4 sm:$0xff]   ;;  %v318_v14 = vlaneseq }
  0x56   : > { %v311_v2 = vld [vmem:[%s307_s21] sm:$0xff]  ;;  %v312_v3 = vld [vmem:[%s307_s21 + $0x8] sm:$0xff]  ;;  %1339 = vmatprep.subr.bf16.mxu1 %v2225_v13  ;;  %s300_s16 = sand.u32 1, %s2574_s25   ;;  %p2876_p1 = scmp.ne.s32.totalorder %s2867_s11, 0 }
  0x57   : > { %v313_v11 = vpack.c.bf16 %v312_v3, %v311_v2  ;;  %v2235_v23 = vld [vmem:[#allocation2 + $0x48] ss:$16 sps:$4 sm:$0xff]   ;;  %v2240_v24 = vld [vmem:[#allocation2 + $0x64] ss:$16 sps:$4 sm:$0xff]   ;;  %v2243_v25 = vld [vmem:[#allocation2 + $0x6c] ss:$16 sps:$4 sm:$0xff]  }
  0x58   : > { %v2238_v26 = vld [vmem:[#allocation2 + $0x60] ss:$16 sps:$4 sm:$0xff]   ;;  %v2241_v27 = vld [vmem:[#allocation2 + $0x68] ss:$16 sps:$4 sm:$0xff]   ;;  %v2246_v28 = vld [vmem:[#allocation2 + $0x84] ss:$16 sps:$4 sm:$0xff]  }
  0x59   : > { %1917 = vmatmul.mubr.msk.bf16.vlgmr.msra.gmra.mrb[0].mxu0 %vm348_vm1, %v313_v11  ;;  %1919 = vmatmul.mubr.msk.bf16.vlgmr.msra.gmra.mrb[0].mxu1 %vm348_vm1, %v313_v11  ;;  %v2249_v29 = vld [vmem:[#allocation2 + $0x8c] ss:$16 sps:$4 sm:$0xff]   ;;  %v2244_v30 = vld [vmem:[#allocation2 + $0x80] ss:$16 sps:$4 sm:$0xff]   ;;  %v2247_v31 = vld [vmem:[#allocation2 + $0x88] ss:$16 sps:$4 sm:$0xff]  }
  0x5a   : > { %1254 = vmatpush1.bf16.msra.mxu0 %v2220_v12  ;;  %1340 = vmatpush1.bf16.msra.mxu1 %v2223_v15  ;;  %v2252_v32 = vld [vmem:[#allocation2 + $0xa4] ss:$16 sps:$4 sm:$0xff]   ;;  %v2255_v33 = vld [vmem:[#allocation2 + $0xac] ss:$16 sps:$4 sm:$0xff]   ;;  %v2250_v34 = vld [vmem:[#allocation2 + $0xa0] ss:$16 sps:$4 sm:$0xff]  }
  0x5b   : > { %1255 = vmatprep.subr.bf16.mxu0 %v2228_v16  ;;  %1341 = vmatprep.subr.bf16.mxu1 %v2231_v17  ;;  %v2253_v35 = vld [vmem:[#allocation2 + $0xa8] ss:$16 sps:$4 sm:$0xff]   ;;  %v2258_v36 = vld [vmem:[#allocation2 + $0xc4] ss:$16 sps:$4 sm:$0xff]   ;;  %v2261_v37 = vld [vmem:[#allocation2 + $0xcc] ss:$16 sps:$4 sm:$0xff]  }
  0x5c   : > { %v2256_v38 = vld [vmem:[#allocation2 + $0xc0] ss:$16 sps:$4 sm:$0xff]   ;;  %v2259_v39 = vld [vmem:[#allocation2 + $0xc8] ss:$16 sps:$4 sm:$0xff]   ;;  %v2264_v40 = vld [vmem:[#allocation2 + $0xe4] ss:$16 sps:$4 sm:$0xff]  }
  0x5d   : > { %v2267_v41 = vld [vmem:[#allocation2 + $0xec] ss:$16 sps:$4 sm:$0xff]   ;;  %v2262_v42 = vld [vmem:[#allocation2 + $0xe0] ss:$16 sps:$4 sm:$0xff]   ;;  %v2265_v43 = vld [vmem:[#allocation2 + $0xe8] ss:$16 sps:$4 sm:$0xff]  }
  0x5e   : > { %1256 = vmatpush1.bf16.msra.mxu0 %v2226_v18  ;;  %1342 = vmatpush1.bf16.msra.mxu1 %v2229_v19  ;;  %v2270_v44 = vld [vmem:[#allocation2 + $0x104] ss:$16 sps:$4 sm:$0xff]   ;;  %v2273_v45 = vld [vmem:[#allocation2 + $0x10c] ss:$16 sps:$4 sm:$0xff]   ;;  %v2268_v46 = vld [vmem:[#allocation2 + $0x100] ss:$16 sps:$4 sm:$0xff]  }
  0x5f   : > { %1257 = vmatprep.subr.bf16.mxu0 %v2234_v20  ;;  %1343 = vmatprep.subr.bf16.mxu1 %v2237_v21  ;;  %v2271_v47 = vld [vmem:[#allocation2 + $0x108] ss:$16 sps:$4 sm:$0xff]   ;;  %v2276_v48 = vld [vmem:[#allocation2 + $0x124] ss:$16 sps:$4 sm:$0xff]   ;;  %v2274_v49 = vld [vmem:[#allocation2 + $0x120] ss:$16 sps:$4 sm:$0xff]  }
  0x60   : > { %v2279_v50 = vld [vmem:[#allocation2 + $0x12c] ss:$16 sps:$4 sm:$0xff]   ;;  %v2277_v51 = vld [vmem:[#allocation2 + $0x128] ss:$16 sps:$4 sm:$0xff]   ;;  %v2282_v52 = vld [vmem:[#allocation2 + $0x144] ss:$16 sps:$4 sm:$0xff]  }
  0x61   : > { %v2285_v53 = vld [vmem:[#allocation2 + $0x14c] ss:$16 sps:$4 sm:$0xff]   ;;  %v2280_v54 = vld [vmem:[#allocation2 + $0x140] ss:$16 sps:$4 sm:$0xff]   ;;  %v2283_v55 = vld [vmem:[#allocation2 + $0x148] ss:$16 sps:$4 sm:$0xff]  }
  0x62   : > { %1258 = vmatpush1.bf16.msra.mxu0 %v2232_v22  ;;  %1344 = vmatpush1.bf16.msra.mxu1 %v2235_v23  ;;  %v2288_v56 = vld [vmem:[#allocation2 + $0x164] ss:$16 sps:$4 sm:$0xff]   ;;  %v2291_v57 = vld [vmem:[#allocation2 + $0x16c] ss:$16 sps:$4 sm:$0xff]   ;;  %v2286_v58 = vld [vmem:[#allocation2 + $0x160] ss:$16 sps:$4 sm:$0xff]  }
  0x63   : > { %1259 = vmatprep.subr.bf16.mxu0 %v2240_v24  ;;  %1345 = vmatprep.subr.bf16.mxu1 %v2243_v25  ;;  %v2289_v59 = vld [vmem:[#allocation2 + $0x168] ss:$16 sps:$4 sm:$0xff]   ;;  %v2294_v60 = vld [vmem:[#allocation2 + $0x184] ss:$16 sps:$4 sm:$0xff]   ;;  %v2297_v61 = vld [vmem:[#allocation2 + $0x18c] ss:$16 sps:$4 sm:$0xff]  }
  0x64   : > { %v2292_v62 = vld [vmem:[#allocation2 + $0x180] ss:$16 sps:$4 sm:$0xff]   ;;  %v2295_v63 = vld [vmem:[#allocation2 + $0x188] ss:$16 sps:$4 sm:$0xff]   ;;  %v2300_v0 = vld [vmem:[#allocation2 + $0x1a4] ss:$16 sps:$4 sm:$0xff]  }
  0x65   : > { %v2303_v1 = vld [vmem:[#allocation2 + $0x1ac] ss:$16 sps:$4 sm:$0xff]   ;;  %v2298_v2 = vld [vmem:[#allocation2 + $0x1a0] ss:$16 sps:$4 sm:$0xff]   ;;  %v2301_v3 = vld [vmem:[#allocation2 + $0x1a8] ss:$16 sps:$4 sm:$0xff]  }
  0x66   : > { %1260 = vmatpush1.bf16.msra.mxu0 %v2238_v26  ;;  %1346 = vmatpush1.bf16.msra.mxu1 %v2241_v27  ;;  %v2306_v4 = vld [vmem:[#allocation2 + $0x1c4] ss:$16 sps:$4 sm:$0xff]   ;;  %v2309_v5 = vld [vmem:[#allocation2 + $0x1cc] ss:$16 sps:$4 sm:$0xff]   ;;  %v2304_v6 = vld [vmem:[#allocation2 + $0x1c0] ss:$16 sps:$4 sm:$0xff]  }
  0x67   : > { %1261 = vmatprep.subr.bf16.mxu0 %v2246_v28  ;;  %1347 = vmatprep.subr.bf16.mxu1 %v2249_v29  ;;  %v2307_v7 = vld [vmem:[#allocation2 + $0x1c8] ss:$16 sps:$4 sm:$0xff]   ;;  %v2312_v8 = vld [vmem:[#allocation2 + $0x1e4] ss:$16 sps:$4 sm:$0xff]   ;;  %v2315_v9 = vld [vmem:[#allocation2 + $0x1ec] ss:$16 sps:$4 sm:$0xff]  }
  0x68   : > { %v2310_v10 = vld [vmem:[#allocation2 + $0x1e0] ss:$16 sps:$4 sm:$0xff]   ;;  %v2313_v11 = vld [vmem:[#allocation2 + $0x1e8] ss:$16 sps:$4 sm:$0xff]   ;;  %v2318_v12 = vld [vmem:[#allocation2 + $0x204] ss:$16 sps:$4 sm:$0xff]  }
  0x69   : > { %v2321_v13 = vld [vmem:[#allocation2 + $0x20c] ss:$16 sps:$4 sm:$0xff]   ;;  %v2769_v15 = vshrl.u32 %v318_v14, 7  ;;  %v316_v17 = vld [vmem:[%s2857_s2] sm:$0xf]  ;;  %s1909_s13 = sshll.u32 %s300_s16, 4 }
  0x6a   : > { %1262 = vmatpush1.bf16.msra.mxu0 %v2244_v30  ;;  %1348 = vmatpush1.bf16.msra.mxu1 %v2247_v31  ;;  %s302_s20 = scalar_lea.vmem [#allocation7], %s1909_s13  ;;  %s2814_s28 = scalar_lea.sflag [#allocation4], %s300_s16 }
  0x6b   : > { %1263 = vmatprep.subr.bf16.mxu0 %v2252_v32  ;;  %1349 = vmatprep.subr.bf16.mxu1 %v2255_v33  ;;  %v320_v16 = vsub.s32 0, %v2769_v15  ;;  %v324_v18 = vsub.s32 1, %v2769_v15  ;;  %v328_v19 = vsub.s32 2, %v2769_v15  ;;  %v332_v20 = vsub.s32 3, %v2769_v15  ;;  %s1817_s21 = sshll.u32 %s302_s20, 4  ;;  %s2591_s9 = smov [#allocation7]   ;;  %s2812_s21 = int_to_ptr.vmem [resolvable:$true] %s1817_s21 }
  0x6c   : > { %s2512_s8 = scalar_lea.vmem %s2812_s21, 256  ;;  %s2516_s15 = sshll.u32 %s2591_s9, 4  ;;  %s2517_s15 = int_to_ptr.vmem [resolvable:$false] %s2516_s15 }
  0x6d   : > { %v321_v21 = vrot.slane %v316_v17, %v320_v16  ;;  %v325_v22 = vrot.slane %v316_v17, %v324_v18  ;;  %v329_v23 = vrot.slane %v316_v17, %v328_v19  ;;  %v333_v24 = vrot.slane %v316_v17, %v332_v20  ;;  %v2355_v17 = vld [vmem:[#allocation2 + $0x2c8] ss:$16 sps:$4 sm:$0xff]   ;;  %p2513_p10 = scmp.ne.s32.totalorder %s2812_s21, %s2512_s8  ;;  %s2518_s10 = scalar_lea.vmem %s2517_s15, 512 }
  0x6e   : > { %1264 = vmatpush1.bf16.msra.mxu0 %v2250_v34  ;;  %1350 = vmatpush1.bf16.msra.mxu1 %v2253_v35  ;;  %p2519_p4 = scmp.lt.s32.totalorder %s2812_s21, %s2517_s15  ;;  %p2520_p7 = scmp.lt.s32.totalorder %s2518_s10, %s2512_s8 }
  0x6f   : > { %1265 = vmatprep.subr.bf16.mxu0 %v2258_v36  ;;  %1351 = vmatprep.subr.bf16.mxu1 %v2261_v37  ;;  %p2514_p2 = pnand %p2513_p10, %p2876_p1 }
  0x70   : > { %p2521_p8 = por %p2520_p7, %p2519_p4 }
  0x71   : > { %p2515_p3 = pneg %p2514_p2 }
  0x72   : > { %1266 = vmatpush1.bf16.msra.mxu0 %v2256_v38  ;;  %1352 = vmatpush1.bf16.msra.mxu1 %v2259_v39 }
  0x73   : > { %1267 = vmatprep.subr.bf16.mxu0 %v2264_v40  ;;  %1353 = vmatprep.subr.bf16.mxu1 %v2267_v41  ;;  %p2522_p11 = pnand %p2521_p8, %p2515_p3 }
  0x76   : > { %1268 = vmatpush1.bf16.msra.mxu0 %v2262_v42  ;;  %1354 = vmatpush1.bf16.msra.mxu1 %v2265_v43 }
  0x77   : > { %1269 = vmatprep.subr.bf16.mxu0 %v2270_v44  ;;  %1355 = vmatprep.subr.bf16.mxu1 %v2273_v45 }
  0x7a   : > { %1270 = vmatpush1.bf16.msra.mxu0 %v2268_v46  ;;  %1356 = vmatpush1.bf16.msra.mxu1 %v2271_v47 }
  0x7b   : > { %1271 = vmatprep.subr.bf16.mxu0 %v2276_v48  ;;  %1357 = vmatprep.subr.bf16.mxu1 %v2279_v50 }
  0x7e   : > { %1272 = vmatpush1.bf16.msra.mxu0 %v2274_v49  ;;  %1358 = vmatpush1.bf16.msra.mxu1 %v2277_v51  ;;  %v2316_v51 = vld [vmem:[#allocation2 + $0x200] ss:$16 sps:$4 sm:$0xff]  }
  0x7f   : > { %1273 = vmatprep.subr.bf16.mxu0 %v2282_v52  ;;  %1359 = vmatprep.subr.bf16.mxu1 %v2285_v53  ;;  %v2319_v52 = vld [vmem:[#allocation2 + $0x208] ss:$16 sps:$4 sm:$0xff]  }
  0x82   : > { %1274 = vmatpush1.bf16.msra.mxu0 %v2280_v54  ;;  %1360 = vmatpush1.bf16.msra.mxu1 %v2283_v55  ;;  %v2324_v54 = vld [vmem:[#allocation2 + $0x224] ss:$16 sps:$4 sm:$0xff]   ;;  %v2327_v55 = vld [vmem:[#allocation2 + $0x22c] ss:$16 sps:$4 sm:$0xff]  }
  0x83   : > { %1275 = vmatprep.subr.bf16.mxu0 %v2288_v56  ;;  %1361 = vmatprep.subr.bf16.mxu1 %v2291_v57  ;;  %v2322_v57 = vld [vmem:[#allocation2 + $0x220] ss:$16 sps:$4 sm:$0xff]  }
  0x86   : > { %1276 = vmatpush1.bf16.msra.mxu0 %v2286_v58  ;;  %1362 = vmatpush1.bf16.msra.mxu1 %v2289_v59  ;;  %v2325_v58 = vld [vmem:[#allocation2 + $0x228] ss:$16 sps:$4 sm:$0xff]   ;;  %v2330_v59 = vld [vmem:[#allocation2 + $0x244] ss:$16 sps:$4 sm:$0xff]  }
  0x87   : > { %1277 = vmatprep.subr.bf16.mxu0 %v2294_v60  ;;  %1363 = vmatprep.subr.bf16.mxu1 %v2297_v61  ;;  %v2333_v60 = vld [vmem:[#allocation2 + $0x24c] ss:$16 sps:$4 sm:$0xff]   ;;  %v2328_v61 = vld [vmem:[#allocation2 + $0x240] ss:$16 sps:$4 sm:$0xff]  }
  0x8a   : > { %1278 = vmatpush1.bf16.msra.mxu0 %v2292_v62  ;;  %1364 = vmatpush1.bf16.msra.mxu1 %v2295_v63  ;;  %v2331_v62 = vld [vmem:[#allocation2 + $0x248] ss:$16 sps:$4 sm:$0xff]   ;;  %v2336_v63 = vld [vmem:[#allocation2 + $0x264] ss:$16 sps:$4 sm:$0xff]  }
  0x8b   : > { %1279 = vmatprep.subr.bf16.mxu0 %v2300_v0  ;;  %1365 = vmatprep.subr.bf16.mxu1 %v2303_v1  ;;  %v2339_v0 = vld [vmem:[#allocation2 + $0x26c] ss:$16 sps:$4 sm:$0xff]   ;;  %v2334_v1 = vld [vmem:[#allocation2 + $0x260] ss:$16 sps:$4 sm:$0xff]  }
  0x8e   : > { %1280 = vmatpush1.bf16.msra.mxu0 %v2298_v2  ;;  %1366 = vmatpush1.bf16.msra.mxu1 %v2301_v3  ;;  %v2337_v2 = vld [vmem:[#allocation2 + $0x268] ss:$16 sps:$4 sm:$0xff]   ;;  %v2342_v3 = vld [vmem:[#allocation2 + $0x284] ss:$16 sps:$4 sm:$0xff]  }
  0x8f   : > { %1281 = vmatprep.subr.bf16.mxu0 %v2306_v4  ;;  %1367 = vmatprep.subr.bf16.mxu1 %v2309_v5  ;;  %v2345_v4 = vld [vmem:[#allocation2 + $0x28c] ss:$16 sps:$4 sm:$0xff]   ;;  %v2340_v5 = vld [vmem:[#allocation2 + $0x280] ss:$16 sps:$4 sm:$0xff]  }
  0x92   : > { %1282 = vmatpush1.bf16.msra.mxu0 %v2304_v6  ;;  %1368 = vmatpush1.bf16.msra.mxu1 %v2307_v7  ;;  %v2343_v6 = vld [vmem:[#allocation2 + $0x288] ss:$16 sps:$4 sm:$0xff]   ;;  %v2348_v7 = vld [vmem:[#allocation2 + $0x2a4] ss:$16 sps:$4 sm:$0xff]  }
  0x93   : > { %1283 = vmatprep.subr.bf16.mxu0 %v2312_v8  ;;  %1369 = vmatprep.subr.bf16.mxu1 %v2315_v9  ;;  %v2351_v8 = vld [vmem:[#allocation2 + $0x2ac] ss:$16 sps:$4 sm:$0xff]   ;;  %v2346_v9 = vld [vmem:[#allocation2 + $0x2a0] ss:$16 sps:$4 sm:$0xff]  }
  0x96   : > { %1284 = vmatpush1.bf16.msra.mxu0 %v2310_v10  ;;  %1370 = vmatpush1.bf16.msra.mxu1 %v2313_v11  ;;  %v2349_v10 = vld [vmem:[#allocation2 + $0x2a8] ss:$16 sps:$4 sm:$0xff]   ;;  %v2354_v11 = vld [vmem:[#allocation2 + $0x2c4] ss:$16 sps:$4 sm:$0xff]  }
  0x97   : > { %1296 = vmatprep.subr.bf16.mxu0 %v2318_v12  ;;  %1382 = vmatprep.subr.bf16.mxu1 %v2321_v13  ;;  %v2357_v12 = vld [vmem:[#allocation2 + $0x2cc] ss:$16 sps:$4 sm:$0xff]   ;;  %v2352_v13 = vld [vmem:[#allocation2 + $0x2c0] ss:$16 sps:$4 sm:$0xff]  }
 0x12c   : > { %v399_v25 = vpop.f32.mrb[0].mxu0  ;;  %v442_v28 = vpop.f32.mrb[0].mxu1 }
 0x12d   : > { %v400_v26 = vadd.f32 %v399_v25, %v321_v21  ;;  %v401_v27 = vpop.f32.mrb[1].mxu0  ;;  %v443_v31 = vadd.f32 %v442_v28, %v329_v23  ;;  %v444_v32 = vpop.f32.mrb[1].mxu1  ;;  %v2366_v25 = vld [vmem:[#allocation2 + $0x304] ss:$16 sps:$4 sm:$0xff]   ;;  %v2367_v28 = vld [vmem:[#allocation2 + $0x308] ss:$16 sps:$4 sm:$0xff]  }
 0x12e   : > { %v402_v29 = vadd.f32 %v401_v27, %v325_v22  ;;  %v403_v30 = vpop.f32.mrb[2].mxu0  ;;  %v445_v35 = vadd.f32 %v444_v32, %v333_v24  ;;  %v446_v36 = vpop.f32.mrb[2].mxu1  ;;  %v2364_v27 = vld [vmem:[#allocation2 + $0x300] ss:$16 sps:$4 sm:$0xff]   ;;  %v2373_v32 = vld [vmem:[#allocation2 + $0x328] ss:$16 sps:$4 sm:$0xff]  }
 0x12f   : > { %v404_v33 = vadd.f32 %v403_v30, %v321_v21  ;;  %v405_v34 = vpop.f32.mrb[3].mxu0  ;;  %v453_v38 = vmax.f32 %v443_v31, 0.0  ;;  %v447_v39 = vadd.f32 %v446_v36, %v329_v23  ;;  %v448_v40 = vpop.f32.mrb[3].mxu1  ;;  %v451_v41 = vmax.f32 %v400_v26, 0.0  ;;  %v2360_v21 = vld [vmem:[#allocation2 + $0x2e4] ss:$16 sps:$4 sm:$0xff]  }
 0x130   : > { %v406_v37 = vadd.f32 %v405_v34, %v325_v22  ;;  %v454_v43 = vmax.f32 %v445_v35, 0.0  ;;  %v449_v44 = vadd.f32 %v448_v40, %v333_v24  ;;  %v452_v45 = vmax.f32 %v402_v29, 0.0  ;;  %v2363_v22 = vld [vmem:[#allocation2 + $0x2ec] ss:$16 sps:$4 sm:$0xff]   ;;  %v2358_v23 = vld [vmem:[#allocation2 + $0x2e0] ss:$16 sps:$4 sm:$0xff]  }
 0x131   : > { %v455_v42 = vmax.f32 %v404_v33, 0.0  ;;  %v457_v47 = vmax.f32 %v447_v39, 0.0  ;;  %v2361_v24 = vld [vmem:[#allocation2 + $0x2e8] ss:$16 sps:$4 sm:$0xff]   ;;  %v2369_v26 = vld [vmem:[#allocation2 + $0x30c] ss:$16 sps:$4 sm:$0xff]  }
 0x132   : > { %v456_v46 = vmax.f32 %v406_v37, 0.0  ;;  %v458_v49 = vmax.f32 %v449_v44, 0.0  ;;  %v2372_v29 = vld [vmem:[#allocation2 + $0x324] ss:$16 sps:$4 sm:$0xff]   ;;  %v2375_v30 = vld [vmem:[#allocation2 + $0x32c] ss:$16 sps:$4 sm:$0xff]  }
 0x133   : > { %v459_v48 = vpack.c.bf16 %v455_v42, %v451_v41  ;;  %v2786_v53 = vpack.c.bf16 %v457_v47, %v453_v38  ;;  %v2370_v31 = vld [vmem:[#allocation2 + $0x320] ss:$16 sps:$4 sm:$0xff]   ;;  %v2378_v33 = vld [vmem:[#allocation2 + $0x344] ss:$16 sps:$4 sm:$0xff]   ;;  %v2381_v34 = vld [vmem:[#allocation2 + $0x34c] ss:$16 sps:$4 sm:$0xff]  }
 0x134   : > { %v460_v50 = vpack.c.bf16 %v456_v46, %v452_v45  ;;  %v462_v56 = vpack.c.bf16 %v458_v49, %v454_v43  ;;  %v2376_v35 = vld [vmem:[#allocation2 + $0x340] ss:$16 sps:$4 sm:$0xff]   ;;  %v2379_v36 = vld [vmem:[#allocation2 + $0x348] ss:$16 sps:$4 sm:$0xff]   ;;  %v2384_v37 = vld [vmem:[#allocation2 + $0x364] ss:$16 sps:$4 sm:$0xff]  }
 0x135   : > { %v2387_v38 = vld [vmem:[#allocation2 + $0x36c] ss:$16 sps:$4 sm:$0xff]   ;;  %v2382_v39 = vld [vmem:[#allocation2 + $0x360] ss:$16 sps:$4 sm:$0xff]   ;;  %v2385_v40 = vld [vmem:[#allocation2 + $0x368] ss:$16 sps:$4 sm:$0xff]  }
 0x136   : > { %1285 = vmatprep.mubr.bf16.mxu0 %v460_v50  ;;  %1371 = vmatprep.mubr.bf16.mxu1 %v460_v50  ;;  %v2390_v41 = vld [vmem:[#allocation2 + $0x384] ss:$16 sps:$4 sm:$0xff]   ;;  %v2393_v42 = vld [vmem:[#allocation2 + $0x38c] ss:$16 sps:$4 sm:$0xff]   ;;  %v2388_v43 = vld [vmem:[#allocation2 + $0x380] ss:$16 sps:$4 sm:$0xff]  }
 0x137   : > { %1286 = vmatmul.mubr.bf16.vlgmr.msra.gmra.mrb[4].mxu0 %v459_v48  ;;  %1372 = vmatmul.mubr.bf16.vlgmr.msra.gmra.mrb[4].mxu1 %v459_v48  ;;  %v2391_v44 = vld [vmem:[#allocation2 + $0x388] ss:$16 sps:$4 sm:$0xff]   ;;  %v2396_v45 = vld [vmem:[#allocation2 + $0x3a4] ss:$16 sps:$4 sm:$0xff]   ;;  %v2399_v46 = vld [vmem:[#allocation2 + $0x3ac] ss:$16 sps:$4 sm:$0xff]  }
 0x138   : > { %1297 = vmatpush1.bf16.msra.mxu0 %v2316_v51  ;;  %1383 = vmatpush1.bf16.msra.mxu1 %v2319_v52  ;;  %v2394_v47 = vld [vmem:[#allocation2 + $0x3a0] ss:$16 sps:$4 sm:$0xff]   ;;  %v2397_v48 = vld [vmem:[#allocation2 + $0x3a8] ss:$16 sps:$4 sm:$0xff]   ;;  %v2402_v49 = vld [vmem:[#allocation2 + $0x3c4] ss:$16 sps:$4 sm:$0xff]  }
 0x139   : > { %1298 = vmatprep.subr.bf16.mxu0 %v2324_v54  ;;  %1384 = vmatprep.subr.bf16.mxu1 %v2327_v55  ;;  %v2405_v50 = vld [vmem:[#allocation2 + $0x3cc] ss:$16 sps:$4 sm:$0xff]   ;;  %v2400_v51 = vld [vmem:[#allocation2 + $0x3c0] ss:$16 sps:$4 sm:$0xff]   ;;  %v2403_v52 = vld [vmem:[#allocation2 + $0x3c8] ss:$16 sps:$4 sm:$0xff]  }
 0x13a   : > { %1328 = vmatprep.mubr.bf16.mxu0 %v462_v56  ;;  %1414 = vmatprep.mubr.bf16.mxu1 %v462_v56  ;;  %v2408_v54 = vld [vmem:[#allocation2 + $0x3e4] ss:$16 sps:$4 sm:$0xff]   ;;  %v2411_v55 = vld [vmem:[#allocation2 + $0x3ec] ss:$16 sps:$4 sm:$0xff]   ;;  %v2406_v56 = vld [vmem:[#allocation2 + $0x3e0] ss:$16 sps:$4 sm:$0xff]  }
 0x13c   : > { %1299 = vmatpush1.bf16.msra.mxu0 %v2322_v57  ;;  %1385 = vmatpush1.bf16.msra.mxu1 %v2325_v58  ;;  %v2409_v57 = vld [vmem:[#allocation2 + $0x3e8] ss:$16 sps:$4 sm:$0xff]   ;;  %v2412_v58 = vld [vmem:[#allocation5 + $0x40] sm:$0xff]  }
 0x13d   : > { %1300 = vmatprep.subr.bf16.mxu0 %v2330_v59  ;;  %1386 = vmatprep.subr.bf16.mxu1 %v2333_v60  ;;  %v2413_v59 = vld [vmem:[#allocation5 + $0xc0] sm:$0xff]  }
 0x13e   : > { %v2414_v60 = vld [vmem:[#allocation5] sm:$0xff]  }
 0x140   : > { %1301 = vmatpush1.bf16.msra.mxu0 %v2328_v61  ;;  %1387 = vmatpush1.bf16.msra.mxu1 %v2331_v62  ;;  %v2415_v61 = vld [vmem:[#allocation5 + $0x80] sm:$0xff]   ;;  %v2416_v62 = vld [vmem:[#allocation5 + $0x48] sm:$0xff]  }
 0x141   : > { %1302 = vmatprep.subr.bf16.mxu0 %v2336_v63  ;;  %1388 = vmatprep.subr.bf16.mxu1 %v2339_v0  ;;  %v2417_v63 = vld [vmem:[#allocation5 + $0xc8] sm:$0xff]  }
 0x142   : > { %v2418_v0 = vld [vmem:[#allocation5 + $0x8] sm:$0xff]  }
 0x144   : > { %1303 = vmatpush1.bf16.msra.mxu0 %v2334_v1  ;;  %1389 = vmatpush1.bf16.msra.mxu1 %v2337_v2  ;;  %v2419_v1 = vld [vmem:[#allocation5 + $0x88] sm:$0xff]   ;;  %v2420_v2 = vld [vmem:[#allocation5 + $0x50] sm:$0xff]  }
 0x145   : > { %1304 = vmatprep.subr.bf16.mxu0 %v2342_v3  ;;  %1390 = vmatprep.subr.bf16.mxu1 %v2345_v4  ;;  %v2421_v3 = vld [vmem:[#allocation5 + $0xd0] sm:$0xff]  }
 0x146   : > { %v2422_v4 = vld [vmem:[#allocation5 + $0x10] sm:$0xff]  }
 0x148   : > { %1305 = vmatpush1.bf16.msra.mxu0 %v2340_v5  ;;  %1391 = vmatpush1.bf16.msra.mxu1 %v2343_v6  ;;  %v2423_v5 = vld [vmem:[#allocation5 + $0x90] sm:$0xff]   ;;  %v2424_v6 = vld [vmem:[#allocation5 + $0x58] sm:$0xff]  }
 0x149   : > { %1306 = vmatprep.subr.bf16.mxu0 %v2348_v7  ;;  %1392 = vmatprep.subr.bf16.mxu1 %v2351_v8  ;;  %v2425_v7 = vld [vmem:[#allocation5 + $0xd8] sm:$0xff]  }
 0x14a   : > { %v2426_v8 = vld [vmem:[#allocation5 + $0x18] sm:$0xff]  }
 0x14c   : > { %1307 = vmatpush1.bf16.msra.mxu0 %v2346_v9  ;;  %1393 = vmatpush1.bf16.msra.mxu1 %v2349_v10  ;;  %v2428_v9 = vld [vmem:[#allocation5 + $0x60] sm:$0xff]  }
 0x14d   : > { %1308 = vmatprep.subr.bf16.mxu0 %v2354_v11  ;;  %1394 = vmatprep.subr.bf16.mxu1 %v2357_v12  ;;  %v2429_v10 = vld [vmem:[#allocation5 + $0xe0] sm:$0xff]  }
 0x14e   : > { %v2430_v11 = vld [vmem:[#allocation5 + $0x20] sm:$0xff]  }
 0x14f   : > { %v2431_v12 = vld [vmem:[#allocation5 + $0xa0] sm:$0xff]  }
 0x150   : > { %1309 = vmatpush1.bf16.msra.mxu0 %v2352_v13  ;;  %1395 = vmatpush1.bf16.msra.mxu1 %v2355_v17  ;;  %v2432_v13 = vld [vmem:[#allocation5 + $0x68] sm:$0xff]  }
 0x151   : > { %1310 = vmatprep.subr.bf16.mxu0 %v2360_v21  ;;  %1396 = vmatprep.subr.bf16.mxu1 %v2363_v22  ;;  %v2433_v17 = vld [vmem:[#allocation5 + $0xe8] sm:$0xff]  }
 0x152   : > { %v2434_v21 = vld [vmem:[#allocation5 + $0x28] sm:$0xff]  }
 0x153   : > { %v2435_v22 = vld [vmem:[#allocation5 + $0xa8] sm:$0xff]  }
 0x154   : > { %1311 = vmatpush1.bf16.msra.mxu0 %v2358_v23  ;;  %1397 = vmatpush1.bf16.msra.mxu1 %v2361_v24  ;;  %v2436_v23 = vld [vmem:[#allocation5 + $0x70] sm:$0xff]  }
 0x155   : > { %1312 = vmatprep.subr.bf16.mxu0 %v2366_v25  ;;  %1398 = vmatprep.subr.bf16.mxu1 %v2369_v26  ;;  %v2437_v24 = vld [vmem:[#allocation5 + $0xf0] sm:$0xff]  }
 0x156   : > { %v2438_v25 = vld [vmem:[#allocation5 + $0x30] sm:$0xff]  }
 0x157   : > { %v2439_v26 = vld [vmem:[#allocation5 + $0xb0] sm:$0xff]  }
 0x158   : > { %1313 = vmatpush1.bf16.msra.mxu0 %v2364_v27  ;;  %1399 = vmatpush1.bf16.msra.mxu1 %v2367_v28  ;;  %v2440_v27 = vld [vmem:[#allocation5 + $0x78] sm:$0xff]  }
 0x159   : > { %1314 = vmatprep.subr.bf16.mxu0 %v2372_v29  ;;  %1400 = vmatprep.subr.bf16.mxu1 %v2375_v30  ;;  %v2441_v28 = vld [vmem:[#allocation5 + $0xf8] sm:$0xff]  }
 0x15a   : > { %v2442_v29 = vld [vmem:[#allocation5 + $0x38] sm:$0xff]  }
 0x15b   : > { %v2443_v30 = vld [vmem:[#allocation5 + $0xb8] sm:$0xff]  }
 0x15c   : > { %1315 = vmatpush1.bf16.msra.mxu0 %v2370_v31  ;;  %1401 = vmatpush1.bf16.msra.mxu1 %v2373_v32  ;;  %v591_v31 = vld [vmem:[%s2859_s4] sm:$0xf] }
 0x15d   : > { %1316 = vmatprep.subr.bf16.mxu0 %v2378_v33  ;;  %1402 = vmatprep.subr.bf16.mxu1 %v2381_v34  ;;  %v596_v32 = vrot.slane %v591_v31, %v320_v16  ;;  %v604_v33 = vrot.slane %v591_v31, %v328_v19  ;;  %v600_v34 = vrot.slane %v591_v31, %v324_v18 }
 0x160   : > { %1317 = vmatpush1.bf16.msra.mxu0 %v2376_v35  ;;  %1403 = vmatpush1.bf16.msra.mxu1 %v2379_v36  ;;  %v608_v35 = vrot.slane %v591_v31, %v332_v20 }
 0x161   : > { %1318 = vmatprep.subr.bf16.mxu0 %v2384_v37  ;;  %1404 = vmatprep.subr.bf16.mxu1 %v2387_v38 }
 0x164   : > { %1319 = vmatpush1.bf16.msra.mxu0 %v2382_v39  ;;  %1405 = vmatpush1.bf16.msra.mxu1 %v2385_v40 }
 0x165   : > { %1320 = vmatprep.subr.bf16.mxu0 %v2390_v41  ;;  %1406 = vmatprep.subr.bf16.mxu1 %v2393_v42 }
 0x168   : > { %1321 = vmatpush1.bf16.msra.mxu0 %v2388_v43  ;;  %1407 = vmatpush1.bf16.msra.mxu1 %v2391_v44 }
 0x169   : > { %1322 = vmatprep.subr.bf16.mxu0 %v2396_v45  ;;  %1408 = vmatprep.subr.bf16.mxu1 %v2399_v46 }
 0x16c   : > { %1323 = vmatpush1.bf16.msra.mxu0 %v2394_v47  ;;  %1409 = vmatpush1.bf16.msra.mxu1 %v2397_v48 }
 0x16d   : > { %1324 = vmatprep.subr.bf16.mxu0 %v2402_v49  ;;  %1410 = vmatprep.subr.bf16.mxu1 %v2405_v50 }
 0x170   : > { %1325 = vmatpush1.bf16.msra.mxu0 %v2400_v51  ;;  %1411 = vmatpush1.bf16.msra.mxu1 %v2403_v52 }
 0x171   : > { %1326 = vmatprep.subr.bf16.mxu0 %v2408_v54  ;;  %1412 = vmatprep.subr.bf16.mxu1 %v2411_v55 }
 0x174   : > { %1327 = vmatpush1.bf16.msra.mxu0 %v2406_v56  ;;  %1413 = vmatpush1.bf16.msra.mxu1 %v2409_v57 }
 0x175   : > { %2089 = vmatprep.subr.bf16.mxu0 %v2412_v58  ;;  %2111 = vmatprep.subr.bf16.mxu1 %v2413_v59 }
 0x177   : > { %1329 = vmatmul.mubr.bf16.vlgmr.msra.gmra.mrb[4].mxu0 %v2786_v53  ;;  %1415 = vmatmul.mubr.bf16.vlgmr.msra.gmra.mrb[4].mxu1 %v2786_v53  ;;  %v2427_v53 = vld [vmem:[#allocation5 + $0x98] sm:$0xff]  }
 0x178   : > { %2090 = vmatpush3.bf16.msra.mxu0 %v2414_v60  ;;  %2112 = vmatpush3.bf16.msra.mxu1 %v2415_v61 }
 0x179   : > { %2091 = vmatprep.subr.bf16.mxu0 %v2416_v62  ;;  %2113 = vmatprep.subr.bf16.mxu1 %v2417_v63  ;;  %v2048_v62 = vld [vmem:[%s2861_s6] ss:$0 sm:$0xff] }
 0x17c   : > { %2092 = vmatpush3.bf16.msra.mxu0 %v2418_v0  ;;  %2114 = vmatpush3.bf16.msra.mxu1 %v2419_v1 }
 0x17d   : > { %2093 = vmatprep.subr.bf16.mxu0 %v2420_v2  ;;  %2115 = vmatprep.subr.bf16.mxu1 %v2421_v3 }
 0x180   : > { %2094 = vmatpush3.bf16.msra.mxu0 %v2422_v4  ;;  %2116 = vmatpush3.bf16.msra.mxu1 %v2423_v5 }
 0x181   : > { %2095 = vmatprep.subr.bf16.mxu0 %v2424_v6  ;;  %2117 = vmatprep.subr.bf16.mxu1 %v2425_v7 }
 0x184   : > { %2096 = vmatpush3.bf16.msra.mxu0 %v2426_v8  ;;  %2118 = vmatpush3.bf16.msra.mxu1 %v2427_v53 }
 0x185   : > { %2097 = vmatprep.subr.bf16.mxu0 %v2428_v9  ;;  %2119 = vmatprep.subr.bf16.mxu1 %v2429_v10 }
 0x188   : > { %2098 = vmatpush3.bf16.msra.mxu0 %v2430_v11  ;;  %2120 = vmatpush3.bf16.msra.mxu1 %v2431_v12 }
 0x189   : > { %2099 = vmatprep.subr.bf16.mxu0 %v2432_v13  ;;  %2121 = vmatprep.subr.bf16.mxu1 %v2433_v17 }
 0x18c   : > { %2100 = vmatpush3.bf16.msra.mxu0 %v2434_v21  ;;  %2122 = vmatpush3.bf16.msra.mxu1 %v2435_v22 }
 0x18d   : > { %2101 = vmatprep.subr.bf16.mxu0 %v2436_v23  ;;  %2123 = vmatprep.subr.bf16.mxu1 %v2437_v24  ;;  %v1783_v24 = vand.u32 127, %v318_v14 }
 0x18f   : > { %vm1784_vm2 = vcmp.lt.s32.totalorder %v1783_v24, 64 }
 0x190   : > { %2102 = vmatpush3.bf16.msra.mxu0 %v2438_v25  ;;  %2124 = vmatpush3.bf16.msra.mxu1 %v2439_v26 }
 0x191   : > { %2103 = vmatprep.subr.bf16.mxu0 %v2440_v27  ;;  %2125 = vmatprep.subr.bf16.mxu1 %v2441_v28 }
 0x194   : > { %2104 = vmatpush3.bf16.msra.mxu0 %v2442_v29  ;;  %2126 = vmatpush3.bf16.msra.mxu1 %v2443_v30 }
 0x24a   : > { %v1330_v36 = vpop.f32.mrb[4].mxu0  ;;  %v1416_v37 = vpop.f32.mrb[4].mxu1 }
 0x24b   : > { %v2133_v38 = vadd.f32 %v1330_v36, %v596_v32  ;;  %v2137_v39 = vadd.f32 %v1416_v37, %v604_v33  ;;  %v1332_v40 = vpop.f32.mrb[5].mxu0  ;;  %v1418_v41 = vpop.f32.mrb[5].mxu1 }
 0x24c   : > { %v2134_v42 = vadd.f32 %v1332_v40, %v600_v34  ;;  %v2138_v43 = vadd.f32 %v1418_v41, %v608_v35  ;;  %v1334_v44 = vpop.f32.mrb[6].mxu0  ;;  %v1420_v45 = vpop.f32.mrb[6].mxu1 }
 0x24d   : > { %v2135_v16 = vadd.f32 %v1334_v44, %v596_v32  ;;  %v2139_v46 = vadd.f32 %v1420_v45, %v604_v33  ;;  %v1336_v47 = vpop.f32.mrb[7].mxu0  ;;  %v1422_v19 = vpop.f32.mrb[7].mxu1  ;;  %v1425_v18 = vmax.f32 %v2133_v38, 0.0  ;;  %v1427_v50 = vmax.f32 %v2137_v39, 0.0 }
 0x24e   : > { %v2136_v48 = vadd.f32 %v1336_v47, %v600_v34  ;;  %v2140_v49 = vadd.f32 %v1422_v19, %v608_v35  ;;  %v1426_v51 = vmax.f32 %v2134_v42, 0.0  ;;  %v1428_v52 = vmax.f32 %v2138_v43, 0.0 }
 0x24f   : > { %v1429_v15 = vmax.f32 %v2135_v16, 0.0  ;;  %v1431_v20 = vmax.f32 %v2139_v46, 0.0 }
 0x250   : > { %v1430_v54 = vmax.f32 %v2136_v48, 0.0  ;;  %v1432_v55 = vmax.f32 %v2140_v49, 0.0 }
 0x251   : > { %v1433_v56 = vpack.c.bf16 %v1429_v15, %v1425_v18  ;;  %v1435_v57 = vpack.c.bf16 %v1431_v20, %v1427_v50 }
 0x252   : > { %v1434_v58 = vpack.c.bf16 %v1430_v54, %v1426_v51  ;;  %v1436_v59 = vpack.c.bf16 %v1432_v55, %v1428_v52 }
 0x254   : > { %1732 = vmatprep.mubr.bf16.mxu0 %v1434_v58  ;;  %1773 = vmatprep.mubr.bf16.mxu1 %v1436_v59 }
 0x255   : > { %1733 = vmatmul.mubr.bf16.vlgmr.msra.gmra.mrb[8].mxu0 %v1433_v56  ;;  %1774 = vmatmul.mubr.bf16.vlgmr.msra.gmra.mrb[8].mxu1 %v1435_v57 }
 0x328   : > { %v2105_v60 = vpop.f32.mrb[8].mxu0  ;;  %v2127_v61 = vpop.f32.mrb[8].mxu1 }
 0x329   : > { %v2106_v63 = vpop.f32.mrb[9].mxu0  ;;  %v2128_v0 = vpop.f32.mrb[9].mxu1 }
 0x32a   : > { %v2107_v1 = vadd.f32 %v2106_v63, %v2105_v60  ;;  %v2129_v2 = vadd.f32 %v2128_v0, %v2127_v61  ;;  %v2108_v3 = vpop.f32.mrb[10].mxu0  ;;  %v2130_v4 = vpop.f32.mrb[10].mxu1 }
 0x32b   : > { %v2109_v5 = vpop.f32.mrb[11].mxu0  ;;  %v2131_v6 = vpop.f32.mrb[11].mxu1 }
 0x32c   : > { %v1735_v7 = vadd.f32 %v2107_v1, %v2048_v62  ;;  %v2110_v8 = vadd.f32 %v2109_v5, %v2108_v3  ;;  %v2132_v53 = vadd.f32 %v2131_v6, %v2130_v4 }
 0x32e   : > { %v1776_v9 = vadd.f32 %v2129_v2, %v1735_v7  ;;  %v1738_v10 = vadd.f32 %v2110_v8, %v2048_v62 }
 0x330   : > { %v2081_v11 = vmul.f32 -1.442695, %v1776_v9  ;;  %v1779_v12 = vadd.f32 %v2132_v53, %v1738_v10 }
 0x332   : > { %2444 = vpow2.f32 %v2081_v11  ;;  %v2082_v13 = vmul.f32 -1.442695, %v1779_v12 }
 0x334   : > { %2446 = vpow2.f32 %v2082_v13 }
 0x335   : > { %2448 = vtanh.f32 %v1776_v9 }
 0x33c   : > { %v2445_v17 = vpop.eup %2444 }
 0x33d   : > { %v1793_v21 = vadd.f32 1.0, %v2445_v17 }
 0x33e   : > { %v2447_v22 = vpop.eup %2446 }
 0x33f   : > { %2450 = vrcp.f32 %v1793_v21  ;;  %v1794_v23 = vadd.f32 1.0, %v2447_v22  ;;  %v2449_v25 = vpop.eup %2448 }
 0x340   : > { %2452 = vtanh.f32 %v1779_v12 }
 0x341   : > { %2454 = vrcp.f32 %v1794_v23 }
 0x349   : > { %v2451_v26 = vpop.eup %2450 }
 0x34a   : > { %v2453_v27 = vpop.eup %2452  ;;  %v1799_v28 = vsel %vm1784_vm2, %v2449_v25, %v2451_v26 }
 0x34b   : > { %v2455_v14 = vpop.eup %2454  ;;  %1801 = vst [vmem:[%s302_s20] sm:$0xff] %v1799_v28 }
 0x34c   : > { %v1800_v29 = vsel %vm1784_vm2, %v2453_v27, %v2455_v14 }
 0x34d   : > { %1802 = vst [vmem:[%s302_s20 + $0x8] sm:$0xff] %v1800_v29 }
 0x34e   : > { %2525 = shalt.err (!%p2522_p11)
}
 0x34f   : > { %s2526_s14 = scalar_lea.hbm %s2810_s29, 256  ;;  %s2530_s16 = scalar_lea.hbm %s2862_s7, 1024 }
 0x350   : > { %p2527_p13 = scmp.ne.s32.totalorder %s2810_s29, %s2526_s14  ;;  %p2531_p6 = scmp.lt.u32.totalorder %s2810_s29, %s2862_s7 }
 0x351   : > { %p2532_p9 = scmp.lt.u32.totalorder %s2530_s16, %s2526_s14  ;;  %p2534_p10 = scmp.lt.u32.totalorder %s2526_s14, %s2810_s29 }
 0x352   : > { %p2528_p0 = pnand %p2527_p13, %p2876_p1 }
 0x353   : > { %p2533_p12 = por %p2532_p9, %p2531_p6 }
 0x354   : > { %p2529_p5 = pneg %p2528_p0 }
 0x355   : > { %p2535_p2 = por %p2534_p10, %p2533_p12 }
 0x357   : > { %p2536_p3 = pnand %p2535_p2, %p2529_p5 }
 0x359   : > { %2539 = shalt.err (!%p2536_p3)
}
 0x35a   : > { %s2592_s20 = smov 128   ;;  %s2593_s22 = smov 8  }
 0x35b   : > { %2157 = dma.vmem_to_hbm [thread:$0]  (%p2876_p1), %s2812_s21, 256, %s2810_s29, %s2814_s28, %s2592_s20, %s2592_s20, %s2593_s22  }
 0x35c PF: > { %p2174_p4 = scmp.ge.s32.totalorder %s2582_s27, 2  ;;  %s1832_s23 = sand.u32 1, %s2570_s24  }
 0x35d   : > { %p2877_p7 = scmp.ne.s32.totalorder %s2868_s12, 0  ;;  %s1833_s8 = scalar_lea.sflag [#allocation4], %s1832_s23 }
 0x35f   : > { %p2167_p8 = pnand %p2174_p4, %p2877_p7 }
 0x361   : > { %2565 = dma.done.wait (!%p2167_p8), %s1833_s8, 256  }
 0x362   : > { %2567 = vsyncadd (!%p2167_p8), %s1833_s8, 4294967040  ;;  %s2878_s9 = sld [smem:[#allocation11_spill]]  ;;  %p19_p11 = scmp.ge.s32.totalorder %s2659_s30, 6  }
 0x363   : > { %s2879_s24 = smov %s2574_s25  ;;  %s2880_s25 = smov %s2578_s26 }
 0x364   : > { %s2882_s27 = smov %s2659_s30  ;;  %21 = sbr.rel (!%p19_p11) target bundleno = 5 (0x5), region = 92 }
 0x368   : > { %s2881_s26 = smov %s2878_s9 }
 0x36b   :  { %1838 = vsyncpa [#allocation3], 1 }
 0x36c   :  { %1840 = vsyncpa [#allocation3 + $0x1], 1 }
 0x36d   :  { %1841 = vsyncpa [#allocation6], 1 }
 0x36e   :  { %1842 = vsyncpa [#allocation4], 1 }
 0x36f   :  { %1844 = vsyncpa [#allocation4 + $0x1], 1 }

</bundles_post_ra>
